<compile_context>
chip_gen: v7x
topology: tpu7x:2x2x1
jax: 0.10.0
libtpu: 0.0.40
codegen_flags: <defaults>
</compile_context>

<pallas_src>
import jax
import jax.numpy as jnp
from jax.experimental import pallas as pl
from jax.experimental.pallas import tpu as pltpu


def _conv3x3s2p1_bias_relu_kernel(x_ref, w_ref, b_ref, o_ref, pp_ref, pat_ref):
    # x_ref  : [4, OH, OW, Cin]     phase-split input, phase p = 2*rp + cp:
    #                               x_ref[p, i, j, c] = x_nchw[c, 2i+rp, 2j+cp]
    # w_ref  : [K_pad, Cout]        weights, K ordered (kh, kw, ci), zero-padded
    # b_ref  : [1, Cout]            bias (f32)
    # o_ref  : [band_pixels, Cout]  output rows (oh within band, ow) x channels
    # pp_ref : [4, OH+1, OW+1, Cin] zero-padded phase planes (row 0 / col 0 = 0)
    # pat_ref: [band_pixels, K_pad] im2col slab (built entirely in VMEM)
    band = pl.program_id(1)
    _, OH, OW, Cin = x_ref.shape
    band_pixels, K_pad = pat_ref.shape
    band_h = band_pixels // OW
    oh0 = band * band_h

    # ---- fused zero padding: each phase plane gets one zero row (top) and one
    # ---- zero column (left); interior copy is pure VMEM traffic.
    pp_ref[...] = jnp.zeros_like(pp_ref)
    pp_ref[:, pl.ds(1, OH), pl.ds(1, OW), :] = x_ref[...]

    # ---- zero the padded tail of the contraction dim once per step
    k_taps = 9 * Cin
    if K_pad > k_taps:
        pat_ref[:, pl.ds(k_taps, K_pad - k_taps)] = jnp.zeros(
            (band_pixels, K_pad - k_taps), pat_ref.dtype)

    # ---- fused im2col: each of the 9 taps of the 3x3 stride-2 conv is a
    # ---- contiguous (shift 0 or 1) window of one phase plane.
    for kh in range(3):
        qh, rp = divmod(kh - 1, 2)          # kh-1 = 2*qh + rp
        for kw in range(3):
            qw, cp = divmod(kw - 1, 2)
            p = 2 * rp + cp
            win = pp_ref[p, pl.ds(oh0 + qh + 1, band_h), pl.ds(qw + 1, OW), :]
            k0 = (kh * 3 + kw) * Cin
            pat_ref[:, pl.ds(k0, Cin)] = win.reshape(band_pixels, Cin)

    # ---- MXU matmul (f32 accumulate) + bias + ReLU
    acc = jnp.dot(pat_ref[...], w_ref[...], preferred_element_type=jnp.float32)
    acc = jnp.maximum(acc + b_ref[...], 0.0)
    o_ref[...] = acc.astype(o_ref.dtype)


def conv1_relu(x_nchw, w, b, *, max_band_pixels=8192):
    """relu(conv2d(x, w, b, stride=2, padding=1)), NCHW in / NCHW out."""
    N, Cin, H, W = x_nchw.shape
    Cout, cin_w, KH, KW = w.shape
    assert (KH, KW) == (3, 3) and cin_w == Cin
    assert H % 2 == 0 and W % 2 == 0, "phase-split path assumes even H, W"
    OH, OW = H // 2, W // 2
    K = KH * KW * Cin
    K_pad = ((K + 7) // 8) * 8            # sublane-align contraction dim (27 -> 32)

    # Single cheap XLA pre-transform over the small 3-channel input: NCHW ->
    # stride-2 phase planes.  This one copy subsumes the old NCHW->NHWC
    # transpose, the jnp.pad pass and the 9x-duplicating HBM im2col.
    xph = x_nchw.reshape(N, Cin, OH, 2, OW, 2)
    xph = jnp.transpose(xph, (0, 3, 5, 2, 4, 1))      # [N, rp, cp, OH, OW, Cin]
    xph = xph.reshape(N, 4, OH, OW, Cin)

    # Weights [Cout, Cin, KH, KW] -> [K, Cout] with K ordered (kh, kw, ci);
    # zero-pad K -> K_pad (tiny, one-time, never inflates streamed HBM bytes).
    w2 = jnp.transpose(w, (2, 3, 1, 0)).reshape(K, Cout)
    w2 = jnp.pad(w2, ((0, K_pad - K), (0, 0))).astype(x_nchw.dtype)
    b2 = b.reshape(1, Cout).astype(jnp.float32)

    # Row-band grid: bands are fully independent ("parallel"); make sure the
    # grid has >= 2 steps even for N == 1 so both v7x TensorCores get work.
    band_h = OH
    while band_h * OW > max_band_pixels and band_h % 2 == 0:
        band_h //= 2
    if N == 1 and band_h == OH and OH % 2 == 0:
        band_h = OH // 2
    n_bands = OH // band_h
    assert band_h * n_bands == OH
    band_pixels = band_h * OW

    itemsize = jnp.dtype(x_nchw.dtype).itemsize
    cost = pl.CostEstimate(
        flops=2 * N * OH * OW * K * Cout,             # true conv FLOPs
        transcendentals=0,
        bytes_accessed=(xph.size + w2.size) * itemsize
        + b2.size * 4 + N * OH * OW * Cout * itemsize,
    )

    out = pl.pallas_call(
        _conv3x3s2p1_bias_relu_kernel,
        out_shape=jax.ShapeDtypeStruct((N, OH * OW, Cout), x_nchw.dtype),
        grid=(N, n_bands),
        in_specs=[
            # whole phase-split image per batch (resident across its bands)
            pl.BlockSpec((None, 4, OH, OW, Cin), lambda n, b_: (n, 0, 0, 0, 0)),
            pl.BlockSpec((K_pad, Cout), lambda n, b_: (0, 0)),   # resident
            pl.BlockSpec((1, Cout), lambda n, b_: (0, 0)),       # resident
        ],
        out_specs=pl.BlockSpec((None, band_pixels, Cout), lambda n, b_: (n, b_, 0)),
        scratch_shapes=[
            pltpu.VMEM((4, OH + 1, OW + 1, Cin), x_nchw.dtype),   # padded phases
            pltpu.VMEM((band_pixels, K_pad), x_nchw.dtype),       # im2col slab
        ],
        compiler_params=pltpu.CompilerParams(
            dimension_semantics=("parallel", "parallel"),
            vmem_limit_bytes=32 * 1024 * 1024,
        ),
        cost_estimate=cost,
    )(xph, w2, b2)

    # Free row-major reshape + one transpose back to the NCHW interface.
    # TODO(synk): emit NCHW (or hand NHWC to the consumer) directly from the
    # kernel to drop this last HBM pass; likewise a 2/4-pixel fold would widen
    # the 64-lane output stores to 128/256 lanes on v6e/v7x.
    out = out.reshape(N, OH, OW, Cout)
    return jnp.transpose(out, (0, 3, 1, 2))


def model_forward(x_nchw, params):
    # Only conv1 + relu reach the returned value; conv2/conv3 branches are dead
    # in the original forward (conv3 would even fail on a channel mismatch).
    # TODO(synk): dead conv2/conv3 branches intentionally not computed.
    return conv1_relu(x_nchw, params["w1"], params["b1"])


def init_params(key):
    k1, k2 = jax.random.split(key, 2)
    fan_in = 3 * 3 * 3
    bound = 1.0 / jnp.sqrt(fan_in)
    w1 = jax.random.uniform(k1, (64, 3, 3, 3), jnp.float32, -bound, bound)
    b1 = jax.random.uniform(k2, (64,), jnp.float32, -bound, bound)
    return {"w1": w1, "b1": b1}


if __name__ == "__main__":
    key = jax.random.PRNGKey(0)
    pkey, xkey = jax.random.split(key)
    params = init_params(pkey)

    # small shapes consistent with the module's forward (NCHW)
    x = jax.random.normal(xkey, (2, 3, 16, 16), jnp.float32)

    fwd = jax.jit(model_forward)
    out = jax.block_until_ready(fwd(x, params))

    # sanity check against XLA's conv
    ref = jax.lax.conv_general_dilated(
        x, params["w1"], window_strides=(2, 2), padding=((1, 1), (1, 1)),
        dimension_numbers=("NCHW", "OIHW", "NCHW"))
    ref = jnp.maximum(ref + params["b1"].reshape(1, -1, 1, 1), 0.0)
    assert out.shape == (2, 64, 8, 8)
    assert jnp.allclose(out, ref, atol=1e-4, rtol=1e-4)

    print("KERNEL_OK")
</pallas_src>

<mosaic_0001>
module attributes {stable_mosaic.version = 11 : i64} {
  func.func @_conv3x3s2p1_bias_relu_kernel(%arg0: i32, %arg1: i32, %arg2: memref<1x4x8x8x3xf32, #tpu.memory_space<vmem>>, %arg3: memref<32x64xf32, #tpu.memory_space<vmem>>, %arg4: memref<1x64xf32, #tpu.memory_space<vmem>>, %arg5: memref<1x64x64xf32, #tpu.memory_space<vmem>>, %arg6: memref<4x9x9x3xf32, #tpu.memory_space<vmem>>, %arg7: memref<64x32xf32, #tpu.memory_space<vmem>>) attributes {dimension_semantics = [#tpu.dimension_semantics<parallel>, #tpu.dimension_semantics<parallel>], iteration_bounds = array<i64: 2, 1>, scalar_prefetch = 0 : i64, scratch_operands = 2 : i64, tpu.core_type = #tpu.core_type<tc>, window_params = [{transform_indices = @transform_0, window_bounds = array<i64: 1, 4, 8, 8, 3>}, {pipeline_mode = #tpu.pipeline_mode<synchronous>, transform_indices = @transform_1, window_bounds = array<i64: 32, 64>}, {pipeline_mode = #tpu.pipeline_mode<synchronous>, transform_indices = @transform_2, window_bounds = array<i64: 1, 64>}, {transform_indices = @transform_3, window_bounds = array<i64: 1, 64, 64>}]} {
    %c8_i32 = arith.constant 8 : i32
    %0 = arith.muli %arg1, %c8_i32 : i32
    %cst = arith.constant 0.000000e+00 : f32
    %1 = vector.broadcast %cst : f32 to vector<4x9x9x3xf32>
    %c0 = arith.constant 0 : index
    %c0_0 = arith.constant 0 : index
    %c0_1 = arith.constant 0 : index
    %c0_2 = arith.constant 0 : index
    %2 = vector.load %arg6[%c0, %c0_0, %c0_1, %c0_2] : memref<4x9x9x3xf32, #tpu.memory_space<vmem>>, vector<4x9x9x3xf32>
    tpu.vector_store %arg6[%c0, %c0_0, %c0_1, %c0_2], %1 {strides = array<i32>} : memref<4x9x9x3xf32, #tpu.memory_space<vmem>>, vector<4x9x9x3xf32>,
    %c0_3 = arith.constant 0 : index
    %c0_4 = arith.constant 0 : index
    %c0_5 = arith.constant 0 : index
    %c0_6 = arith.constant 0 : index
    %c0_7 = arith.constant 0 : index
    %3 = vector.load %arg2[%c0_3, %c0_4, %c0_5, %c0_6, %c0_7] : memref<1x4x8x8x3xf32, #tpu.memory_space<vmem>>, vector<1x4x8x8x3xf32>
    %4 = vector.shape_cast %3 : vector<1x4x8x8x3xf32> to vector<4x8x8x3xf32>
    %c0_8 = arith.constant 0 : index
    %c1 = arith.constant 1 : index
    %c1_9 = arith.constant 1 : index
    %c0_10 = arith.constant 0 : index
    %5 = vector.load %arg6[%c0_8, %c1, %c1_9, %c0_10] : memref<4x9x9x3xf32, #tpu.memory_space<vmem>>, vector<4x8x8x3xf32>
    tpu.vector_store %arg6[%c0_8, %c1, %c1_9, %c0_10], %4 {strides = array<i32>} : memref<4x9x9x3xf32, #tpu.memory_space<vmem>>, vector<4x8x8x3xf32>,
    %cst_11 = arith.constant 0.000000e+00 : f32
    %6 = vector.broadcast %cst_11 : f32 to vector<64x5xf32>
    %c0_12 = arith.constant 0 : index
    %c27 = arith.constant 27 : index
    %7 = vector.load %arg7[%c0_12, %c27] : memref<64x32xf32, #tpu.memory_space<vmem>>, vector<64x5xf32>
    tpu.vector_store %arg7[%c0_12, %c27], %6 {strides = array<i32>} : memref<64x32xf32, #tpu.memory_space<vmem>>, vector<64x5xf32>,
    %c-1_i32 = arith.constant -1 : i32
    %8 = arith.addi %0, %c-1_i32 : i32
    %c1_i32 = arith.constant 1 : i32
    %9 = arith.addi %8, %c1_i32 : i32
    %c3 = arith.constant 3 : index
    %10 = arith.index_cast %9 : i32 to index
    %c0_13 = arith.constant 0 : index
    %c0_14 = arith.constant 0 : index
    %11 = vector.load %arg6[%c3, %10, %c0_13, %c0_14] : memref<4x9x9x3xf32, #tpu.memory_space<vmem>>, vector<1x8x8x3xf32>
    %12 = vector.shape_cast %11 : vector<1x8x8x3xf32> to vector<8x8x3xf32>
    %13 = vector.shape_cast %12 : vector<8x8x3xf32> to vector<64x3xf32>
    %c0_15 = arith.constant 0 : index
    %c0_16 = arith.constant 0 : index
    %14 = vector.load %arg7[%c0_15, %c0_16] : memref<64x32xf32, #tpu.memory_space<vmem>>, vector<64x3xf32>
    tpu.vector_store %arg7[%c0_15, %c0_16], %13 {strides = array<i32>} : memref<64x32xf32, #tpu.memory_space<vmem>>, vector<64x3xf32>,
    %c-1_i32_17 = arith.constant -1 : i32
    %15 = arith.addi %0, %c-1_i32_17 : i32
    %c1_i32_18 = arith.constant 1 : i32
    %16 = arith.addi %15, %c1_i32_18 : i32
    %c2 = arith.constant 2 : index
    %17 = arith.index_cast %16 : i32 to index
    %c1_19 = arith.constant 1 : index
    %c0_20 = arith.constant 0 : index
    %18 = vector.load %arg6[%c2, %17, %c1_19, %c0_20] : memref<4x9x9x3xf32, #tpu.memory_space<vmem>>, vector<1x8x8x3xf32>
    %19 = vector.shape_cast %18 : vector<1x8x8x3xf32> to vector<8x8x3xf32>
    %20 = vector.shape_cast %19 : vector<8x8x3xf32> to vector<64x3xf32>
    %c0_21 = arith.constant 0 : index
    %c3_22 = arith.constant 3 : index
    %21 = vector.load %arg7[%c0_21, %c3_22] : memref<64x32xf32, #tpu.memory_space<vmem>>, vector<64x3xf32>
    tpu.vector_store %arg7[%c0_21, %c3_22], %20 {strides = array<i32>} : memref<64x32xf32, #tpu.memory_space<vmem>>, vector<64x3xf32>,
    %c-1_i32_23 = arith.constant -1 : i32
    %22 = arith.addi %0, %c-1_i32_23 : i32
    %c1_i32_24 = arith.constant 1 : i32
    %23 = arith.addi %22, %c1_i32_24 : i32
    %c3_25 = arith.constant 3 : index
    %24 = arith.index_cast %23 : i32 to index
    %c1_26 = arith.constant 1 : index
    %c0_27 = arith.constant 0 : index
    %25 = vector.load %arg6[%c3_25, %24, %c1_26, %c0_27] : memref<4x9x9x3xf32, #tpu.memory_space<vmem>>, vector<1x8x8x3xf32>
    %26 = vector.shape_cast %25 : vector<1x8x8x3xf32> to vector<8x8x3xf32>
    %27 = vector.shape_cast %26 : vector<8x8x3xf32> to vector<64x3xf32>
    %c0_28 = arith.constant 0 : index
    %c6 = arith.constant 6 : index
    %28 = vector.load %arg7[%c0_28, %c6] : memref<64x32xf32, #tpu.memory_space<vmem>>, vector<64x3xf32>
    tpu.vector_store %arg7[%c0_28, %c6], %27 {strides = array<i32>} : memref<64x32xf32, #tpu.memory_space<vmem>>, vector<64x3xf32>,
    %c0_i32 = arith.constant 0 : i32
    %29 = arith.addi %0, %c0_i32 : i32
    %c1_i32_29 = arith.constant 1 : i32
    %30 = arith.addi %29, %c1_i32_29 : i32
    %c1_30 = arith.constant 1 : index
    %31 = arith.index_cast %30 : i32 to index
    %c0_31 = arith.constant 0 : index
    %c0_32 = arith.constant 0 : index
    %32 = vector.load %arg6[%c1_30, %31, %c0_31, %c0_32] : memref<4x9x9x3xf32, #tpu.memory_space<vmem>>, vector<1x8x8x3xf32>
    %33 = vector.shape_cast %32 : vector<1x8x8x3xf32> to vector<8x8x3xf32>
    %34 = vector.shape_cast %33 : vector<8x8x3xf32> to vector<64x3xf32>
    %c0_33 = arith.constant 0 : index
    %c9 = arith.constant 9 : index
    %35 = vector.load %arg7[%c0_33, %c9] : memref<64x32xf32, #tpu.memory_space<vmem>>, vector<64x3xf32>
    tpu.vector_store %arg7[%c0_33, %c9], %34 {strides = array<i32>} : memref<64x32xf32, #tpu.memory_space<vmem>>, vector<64x3xf32>,
    %c0_i32_34 = arith.constant 0 : i32
    %36 = arith.addi %0, %c0_i32_34 : i32
    %c1_i32_35 = arith.constant 1 : i32
    %37 = arith.addi %36, %c1_i32_35 : i32
    %c0_36 = arith.constant 0 : index
    %38 = arith.index_cast %37 : i32 to index
    %c1_37 = arith.constant 1 : index
    %c0_38 = arith.constant 0 : index
    %39 = vector.load %arg6[%c0_36, %38, %c1_37, %c0_38] : memref<4x9x9x3xf32, #tpu.memory_space<vmem>>, vector<1x8x8x3xf32>
    %40 = vector.shape_cast %39 : vector<1x8x8x3xf32> to vector<8x8x3xf32>
    %41 = vector.shape_cast %40 : vector<8x8x3xf32> to vector<64x3xf32>
    %c0_39 = arith.constant 0 : index
    %c12 = arith.constant 12 : index
    %42 = vector.load %arg7[%c0_39, %c12] : memref<64x32xf32, #tpu.memory_space<vmem>>, vector<64x3xf32>
    tpu.vector_store %arg7[%c0_39, %c12], %41 {strides = array<i32>} : memref<64x32xf32, #tpu.memory_space<vmem>>, vector<64x3xf32>,
    %c0_i32_40 = arith.constant 0 : i32
    %43 = arith.addi %0, %c0_i32_40 : i32
    %c1_i32_41 = arith.constant 1 : i32
    %44 = arith.addi %43, %c1_i32_41 : i32
    %c1_42 = arith.constant 1 : index
    %45 = arith.index_cast %44 : i32 to index
    %c1_43 = arith.constant 1 : index
    %c0_44 = arith.constant 0 : index
    %46 = vector.load %arg6[%c1_42, %45, %c1_43, %c0_44] : memref<4x9x9x3xf32, #tpu.memory_space<vmem>>, vector<1x8x8x3xf32>
    %47 = vector.shape_cast %46 : vector<1x8x8x3xf32> to vector<8x8x3xf32>
    %48 = vector.shape_cast %47 : vector<8x8x3xf32> to vector<64x3xf32>
    %c0_45 = arith.constant 0 : index
    %c15 = arith.constant 15 : index
    %49 = vector.load %arg7[%c0_45, %c15] : memref<64x32xf32, #tpu.memory_space<vmem>>, vector<64x3xf32>
    tpu.vector_store %arg7[%c0_45, %c15], %48 {strides = array<i32>} : memref<64x32xf32, #tpu.memory_space<vmem>>, vector<64x3xf32>,
    %c0_i32_46 = arith.constant 0 : i32
    %50 = arith.addi %0, %c0_i32_46 : i32
    %c1_i32_47 = arith.constant 1 : i32
    %51 = arith.addi %50, %c1_i32_47 : i32
    %c3_48 = arith.constant 3 : index
    %52 = arith.index_cast %51 : i32 to index
    %c0_49 = arith.constant 0 : index
    %c0_50 = arith.constant 0 : index
    %53 = vector.load %arg6[%c3_48, %52, %c0_49, %c0_50] : memref<4x9x9x3xf32, #tpu.memory_space<vmem>>, vector<1x8x8x3xf32>
    %54 = vector.shape_cast %53 : vector<1x8x8x3xf32> to vector<8x8x3xf32>
    %55 = vector.shape_cast %54 : vector<8x8x3xf32> to vector<64x3xf32>
    %c0_51 = arith.constant 0 : index
    %c18 = arith.constant 18 : index
    %56 = vector.load %arg7[%c0_51, %c18] : memref<64x32xf32, #tpu.memory_space<vmem>>, vector<64x3xf32>
    tpu.vector_store %arg7[%c0_51, %c18], %55 {strides = array<i32>} : memref<64x32xf32, #tpu.memory_space<vmem>>, vector<64x3xf32>,
    %c0_i32_52 = arith.constant 0 : i32
    %57 = arith.addi %0, %c0_i32_52 : i32
    %c1_i32_53 = arith.constant 1 : i32
    %58 = arith.addi %57, %c1_i32_53 : i32
    %c2_54 = arith.constant 2 : index
    %59 = arith.index_cast %58 : i32 to index
    %c1_55 = arith.constant 1 : index
    %c0_56 = arith.constant 0 : index
    %60 = vector.load %arg6[%c2_54, %59, %c1_55, %c0_56] : memref<4x9x9x3xf32, #tpu.memory_space<vmem>>, vector<1x8x8x3xf32>
    %61 = vector.shape_cast %60 : vector<1x8x8x3xf32> to vector<8x8x3xf32>
    %62 = vector.shape_cast %61 : vector<8x8x3xf32> to vector<64x3xf32>
    %c0_57 = arith.constant 0 : index
    %c21 = arith.constant 21 : index
    %63 = vector.load %arg7[%c0_57, %c21] : memref<64x32xf32, #tpu.memory_space<vmem>>, vector<64x3xf32>
    tpu.vector_store %arg7[%c0_57, %c21], %62 {strides = array<i32>} : memref<64x32xf32, #tpu.memory_space<vmem>>, vector<64x3xf32>,
    %c0_i32_58 = arith.constant 0 : i32
    %64 = arith.addi %0, %c0_i32_58 : i32
    %c1_i32_59 = arith.constant 1 : i32
    %65 = arith.addi %64, %c1_i32_59 : i32
    %c3_60 = arith.constant 3 : index
    %66 = arith.index_cast %65 : i32 to index
    %c1_61 = arith.constant 1 : index
    %c0_62 = arith.constant 0 : index
    %67 = vector.load %arg6[%c3_60, %66, %c1_61, %c0_62] : memref<4x9x9x3xf32, #tpu.memory_space<vmem>>, vector<1x8x8x3xf32>
    %68 = vector.shape_cast %67 : vector<1x8x8x3xf32> to vector<8x8x3xf32>
    %69 = vector.shape_cast %68 : vector<8x8x3xf32> to vector<64x3xf32>
    %c0_63 = arith.constant 0 : index
    %c24 = arith.constant 24 : index
    %70 = vector.load %arg7[%c0_63, %c24] : memref<64x32xf32, #tpu.memory_space<vmem>>, vector<64x3xf32>
    tpu.vector_store %arg7[%c0_63, %c24], %69 {strides = array<i32>} : memref<64x32xf32, #tpu.memory_space<vmem>>, vector<64x3xf32>,
    %c0_64 = arith.constant 0 : index
    %c0_65 = arith.constant 0 : index
    %71 = vector.load %arg7[%c0_64, %c0_65] : memref<64x32xf32, #tpu.memory_space<vmem>>, vector<64x32xf32>
    %c0_66 = arith.constant 0 : index
    %c0_67 = arith.constant 0 : index
    %72 = vector.load %arg3[%c0_66, %c0_67] : memref<32x64xf32, #tpu.memory_space<vmem>>, vector<32x64xf32>
    %cst_68 = arith.constant dense<0.000000e+00> : vector<64x64xf32>
    %73 = tpu.matmul %71, %72, %cst_68 {dimension_numbers = #tpu.dot_dimension_numbers<[1], [0], [0], [1], [0, 0, 1, 1], [], []>} : vector<64x32xf32>, vector<32x64xf32>, vector<64x64xf32> -> vector<64x64xf32>
    %c0_69 = arith.constant 0 : index
    %c0_70 = arith.constant 0 : index
    %74 = vector.load %arg4[%c0_69, %c0_70] : memref<1x64xf32, #tpu.memory_space<vmem>>, vector<1x64xf32>
    %75 = vector.broadcast %74 : vector<1x64xf32> to vector<64x64xf32>
    %76 = arith.addf %73, %75 : vector<64x64xf32>
    %cst_71 = arith.constant 0.000000e+00 : f32
    %77 = vector.broadcast %cst_71 : f32 to vector<64x64xf32>
    %78 = arith.maximumf %76, %77 : vector<64x64xf32>
    %c0_72 = arith.constant 0 : index
    %c0_73 = arith.constant 0 : index
    %c0_74 = arith.constant 0 : index
    %79 = vector.load %arg5[%c0_72, %c0_73, %c0_74] : memref<1x64x64xf32, #tpu.memory_space<vmem>>, vector<1x64x64xf32>
    %80 = vector.shape_cast %79 : vector<1x64x64xf32> to vector<64x64xf32>
    %81 = vector.shape_cast %78 : vector<64x64xf32> to vector<1x64x64xf32>
    tpu.vector_store %arg5[%c0_72, %c0_73, %c0_74], %81 {strides = array<i32>} : memref<1x64x64xf32, #tpu.memory_space<vmem>>, vector<1x64x64xf32>,
    return
  }
  func.func @transform_0(%arg0: i32, %arg1: i32) -> (i32, i32, i32, i32, i32) {
    %c0_i32 = arith.constant 0 : i32
    %c0_i32_0 = arith.constant 0 : i32
    %c0_i32_1 = arith.constant 0 : i32
    %c0_i32_2 = arith.constant 0 : i32
    %c0_i32_3 = arith.constant 0 : i32
    return %arg0, %c0_i32, %c0_i32_0, %c0_i32_1, %c0_i32_2 : i32, i32, i32, i32, i32
  }
  func.func @transform_1(%arg0: i32, %arg1: i32) -> (i32, i32) {
    %c0_i32 = arith.constant 0 : i32
    %c0_i32_0 = arith.constant 0 : i32
    %c0_i32_1 = arith.constant 0 : i32
    return %c0_i32, %c0_i32_0 : i32, i32
  }
  func.func @transform_2(%arg0: i32, %arg1: i32) -> (i32, i32) {
    %c0_i32 = arith.constant 0 : i32
    %c0_i32_0 = arith.constant 0 : i32
    %c0_i32_1 = arith.constant 0 : i32
    return %c0_i32, %c0_i32_0 : i32, i32
  }
  func.func @transform_3(%arg0: i32, %arg1: i32) -> (i32, i32, i32) {
    %c0_i32 = arith.constant 0 : i32
    %c0_i32_0 = arith.constant 0 : i32
    return %arg0, %arg1, %c0_i32 : i32, i32, i32
  }
}

</mosaic_0001>

<bundles_post_ra>
// kernel: model_forward.1
= control target key start
LH: loop header
LB: loop body
LE: loop exit
PB: predicated region body
PF: predicated region fallthrough
CT: control target
= control target key end

     0   :  { %8 = vsyncpa [#allocation5], 0  ;;  %s1924_s0 = inlined_call_operand.vmem [shape: f32[2,4,8,8,3], index: 0, kind: input, shape index: {}]   ;;  %s1925_s1 = inlined_call_operand.vmem [shape: f32[32,64], index: 1, kind: input, shape index: {}]   ;;  %s1926_s2 = inlined_call_operand.vmem [shape: f32[1,64], index: 2, kind: input, shape index: {}]   ;;  %s1927_s3 = inlined_call_operand.hbm [shape: f32[2,64,64], index: 3, kind: output, shape index: {}]  }
   0x1   :  { %10 = vsyncpa [#allocation5 + $0x1], 0  ;;  %s1350_s12 = smov 0   ;;  %s1352_s13 = smov 0  }
   0x2   :  { %s1354_s14 = smov 0   ;;  %s1356_s15 = smov 0  }
   0x3   :  { %s1358_s16 = smov 0   ;;  %s1360_s17 = smov 0  }
   0x4 LB: > { %s1032_s18 = sadd.s32 4294967295, %s1316_s17   ;;  %s1033_s19 = sadd.s32 4294967294, %s1316_s17   ;;  %s1316_s17 = sphi %s1360_s17, %s16_s17   ;;  %s1312_s16 = sphi %s1358_s16, %s1934_s16   ;;  %s1308_s15 = sphi %s1356_s15, %s1933_s15   ;;  %s1304_s14 = sphi %s1354_s14, %s1932_s14   ;;  %s1300_s13 = sphi %s1352_s13, %s1931_s13   ;;  %s1296_s12 = sphi %s1350_s12, %s1930_s12  }
   0x5   : > { %s28_s20 = sadd.s32 1, %s1312_s16  ;;  %s105_s21 = sadd.s32 1, %s1304_s14 }
   0x6   : > { %p30_p0 = scmp.ge.s32.totalorder %s28_s20, 2  ;;  %p115_p1 = scmp.ne.s32.totalorder %s1304_s14, %s1300_s13 }
   0x7   : > { %p116_p2 = scmp.eq.s32.totalorder %s1032_s18, 1  ;;  %p121_p3 = scmp.ne.s32.totalorder %s1300_s13, %s1296_s12 }
   0x8   : > { %s1936_s20 = smov (%p30_p0, %s28_s20), 0  ;;  %p122_p5 = scmp.eq.s32.totalorder %s1033_s19, 1 }
   0x9   : > { %p1390_p4 = por %p116_p2, %p115_p1  ;;  %s100_s23 = ssub.s32 %s1312_s16, %s1936_s20 }
   0xa   : > { %p1036_p6 = scmp.ge.s32.totalorder %s1316_s17, 1  ;;  %p103_p7 = scmp.eq.s32.totalorder %s100_s23, 0 }
   0xb   : > { %p1397_p8 = por %p122_p5, %p121_p3  ;;  %p154_p9 = scmp.lt.s32.totalorder %s1316_s17, 3 }
   0xc   : > { %s1403_s25 = scalar_select %p103_p7, %s1304_s14, %s105_s21  }
   0xd   : > { %p155_p10 = pnand %p1036_p6, %p154_p9 }
   0xe   : > { %vm185_vm0 = vcmask (!%p155_p10), 23552   ;;  %vm187_vm1 = vcmask (!%p155_p10), 16384   ;;  %p178_p11 = scmp.lt.s32.totalorder (!%p155_p10), %s1308_s15, 1  ;;  %vm324_vm2 = vcmask (!%p155_p10), 261336   ;;  %v1318_v0 = vmov (!%p155_p10), 0.0   ;;  %s1319_s4 = smov (!%p155_p10), 3  }
   0xf   : > { %158 = sbr.rel (%p155_p10) target bundleno = 540 (0x21c), region = 32  ;;  %223 = vst.msk [vmem:[#allocation2 + $0x120] sm:$0xff] (!%p155_p10), %vm185_vm0, %v1318_v0  ;;  %189 = vst.msk [vmem:[#allocation2 + $0x10] sm:$0xff] (!%p155_p10), %vm185_vm0, %v1318_v0  ;;  %s1320_s5 = smov (!%p155_p10), 6   ;;  %vm394_vm3 = vcmask (!%p155_p10), 48152   ;;  %vm443_vm4 = vcmask (!%p155_p10), 72752  }
  0x10   : > { %224 = vst.msk [vmem:[#allocation2 + $0x128] sm:$0x1] (!%p155_p10), %vm187_vm1, %v1318_v0  ;;  %190 = vst.msk [vmem:[#allocation2 + $0x18] sm:$0x1] (!%p155_p10), %vm187_vm1, %v1318_v0  ;;  %s1321_s6 = smov (!%p155_p10), 9   ;;  %s1322_s7 = smov (!%p155_p10), 12  }
  0x11   : > { %191 = vst.msk [vmem:[#allocation2 + $0x20] sm:$0xff] (!%p155_p10), %vm185_vm0, %v1318_v0  ;;  %193 = vst.msk [vmem:[#allocation2 + $0x30] sm:$0xff] (!%p155_p10), %vm185_vm0, %v1318_v0  ;;  %s1323_s8 = smov (!%p155_p10), 15   ;;  %s1324_s9 = smov (!%p155_p10), 18   ;;  %vm496_vm5 = vcmask (!%p155_p10), 97352   ;;  %vm546_vm6 = vcmask (!%p155_p10), 121952  }
  0x12   : > { %192 = vst.msk [vmem:[#allocation2 + $0x28] sm:$0x1] (!%p155_p10), %vm187_vm1, %v1318_v0  ;;  %194 = vst.msk [vmem:[#allocation2 + $0x38] sm:$0x1] (!%p155_p10), %vm187_vm1, %v1318_v0  ;;  %s1325_s10 = smov (!%p155_p10), 21   ;;  %s1326_s11 = smov (!%p155_p10), 24  }
  0x13   : > { %195 = vst.msk [vmem:[#allocation2 + $0x40] sm:$0xff] (!%p155_p10), %vm185_vm0, %v1318_v0  ;;  %197 = vst.msk [vmem:[#allocation2 + $0x50] sm:$0xff] (!%p155_p10), %vm185_vm0, %v1318_v0  ;;  %vm595_vm7 = vcmask (!%p155_p10), 146552   ;;  %vm646_vm8 = vcmask (!%p155_p10), 171152   ;;  %vm697_vm9 = vcmask (!%p155_p10), 195752   ;;  %vm746_vm10 = vcmask (!%p155_p10), 220352  }
  0x14   : > { %196 = vst.msk [vmem:[#allocation2 + $0x48] sm:$0x1] (!%p155_p10), %vm187_vm1, %v1318_v0  ;;  %198 = vst.msk [vmem:[#allocation2 + $0x58] sm:$0x1] (!%p155_p10), %vm187_vm1, %v1318_v0  ;;  %vm774_vm11 = vcmask (!%p155_p10), 261120   ;;  %vm912_vm12 = vcmask (!%p155_p10), 523264  }
  0x15   : > { %199 = vst.msk [vmem:[#allocation2 + $0x60] sm:$0xff] (!%p155_p10), %vm185_vm0, %v1318_v0  ;;  %201 = vst.msk [vmem:[#allocation2 + $0x70] sm:$0xff] (!%p155_p10), %vm185_vm0, %v1318_v0  ;;  %s1327_s21 = smov (!%p155_p10), [#allocation4]  }
  0x16   : > { %200 = vst.msk [vmem:[#allocation2 + $0x68] sm:$0x1] %vm187_vm1, %v1318_v0  ;;  %202 = vst.msk [vmem:[#allocation2 + $0x78] sm:$0x1] %vm187_vm1, %v1318_v0  ;;  %s179_s26 = scalar_select %p178_p11, %s1308_s15, 1 }
  0x17   : > { %203 = vst.msk [vmem:[#allocation2 + $0x80] sm:$0xff] %vm185_vm0, %v1318_v0  ;;  %207 = vst.msk [vmem:[#allocation2 + $0xa0] sm:$0xff] %vm185_vm0, %v1318_v0  ;;  %v1048_v7 = vld [vmem:[#allocation2 + $0x121] sm:$0xff]  ;;  %s1242_s23 = sshll.u32 %s1327_s21, 4  ;;  %s1243_s23 = int_to_ptr.vmem [resolvable:$false] %s1242_s23 }
  0x18   : > { %204 = vst.msk [vmem:[#allocation2 + $0x88] sm:$0x1] %vm187_vm1, %v1318_v0  ;;  %208 = vst.msk [vmem:[#allocation2 + $0xa8] sm:$0x1] %vm187_vm1, %v1318_v0  ;;  %s1126_s27 = sshll.u32 %s179_s26, 8  ;;  %370 = vrot.lane.b32.xlu0 %v1048_v7, %s1319_s4  ;;  %s1244_s26 = scalar_lea.vmem %s1243_s23, 2048 }
  0x19   : > { %209 = vst.msk [vmem:[#allocation2 + $0xb0] sm:$0xff] %vm185_vm0, %v1318_v0  ;;  %211 = vst.msk [vmem:[#allocation2 + $0xc0] sm:$0xff] %vm185_vm0, %v1318_v0  ;;  %s1564_s30 = scalar_lea.vmem %s1924_s0, %s1126_s27 }
  0x1a   : > { %210 = vst.msk [vmem:[#allocation2 + $0xb8] sm:$0x1] %vm187_vm1, %v1318_v0  ;;  %212 = vst.msk [vmem:[#allocation2 + $0xc8] sm:$0x1] %vm187_vm1, %v1318_v0  ;;  %v275_v1 = vld [vmem:[%s1564_s30 + $0x80] sm:$0xff]  ;;  %v278_v3 = vld [vmem:[%s1564_s30 + $0x98] sm:$0xff] }
  0x1b   : > { %213 = vst.msk [vmem:[#allocation2 + $0xd0] sm:$0xff] %vm185_vm0, %v1318_v0  ;;  %215 = vst.msk [vmem:[#allocation2 + $0xe0] sm:$0xff] %vm185_vm0, %v1318_v0  ;;  %v279_v2 = vld [vmem:[%s1564_s30 + $0xa0] sm:$0xff]  ;;  %v286_v4 = vld [vmem:[%s1564_s30 + $0xd8] sm:$0xff] }
  0x1c   : > { %214 = vst.msk [vmem:[#allocation2 + $0xd8] sm:$0x1] %vm187_vm1, %v1318_v0  ;;  %216 = vst.msk [vmem:[#allocation2 + $0xe8] sm:$0x1] %vm187_vm1, %v1318_v0  ;;  %v283_v5 = vld [vmem:[%s1564_s30 + $0xc0] sm:$0xff]  ;;  %v268_v11 = vld [vmem:[%s1564_s30 + $0x48] sm:$0xff] }
  0x1d   : > { %217 = vst.msk [vmem:[#allocation2 + $0xf0] sm:$0xff] %vm185_vm0, %v1318_v0  ;;  %219 = vst.msk [vmem:[#allocation2 + $0x100] sm:$0xff] %vm185_vm0, %v1318_v0  ;;  %v287_v6 = vld [vmem:[%s1564_s30 + $0xe0] sm:$0xff]  ;;  %v272_v12 = vld [vmem:[%s1564_s30 + $0x68] sm:$0xff] }
  0x1e   : > { %218 = vst.msk [vmem:[#allocation2 + $0xf8] sm:$0x1] %vm187_vm1, %v1318_v0  ;;  %220 = vst.msk [vmem:[#allocation2 + $0x108] sm:$0x1] %vm187_vm1, %v1318_v0  ;;  %v267_v9 = vld [vmem:[%s1564_s30 + $0x40] sm:$0xff]  ;;  %v276_v15 = vld [vmem:[%s1564_s30 + $0x88] sm:$0xff] }
  0x1f   : > { %221 = vst.msk [vmem:[#allocation2 + $0x110] sm:$0xff] %vm185_vm0, %v1318_v0  ;;  %225 = vst.msk [vmem:[#allocation2 + $0x130] sm:$0xff] %vm185_vm0, %v1318_v0  ;;  %v271_v10 = vld [vmem:[%s1564_s30 + $0x60] sm:$0xff]  ;;  %v280_v16 = vld [vmem:[%s1564_s30 + $0xa8] sm:$0xff] }
  0x20   : > { %222 = vst.msk [vmem:[#allocation2 + $0x118] sm:$0x1] %vm187_vm1, %v1318_v0  ;;  %226 = vst.msk [vmem:[#allocation2 + $0x138] sm:$0x1] %vm187_vm1, %v1318_v0  ;;  %v259_v13 = vld [vmem:[%s1564_s30] sm:$0xff]  ;;  %v260_v17 = vld [vmem:[%s1564_s30 + $0x8] sm:$0xff] }
  0x21   : > { %227 = vst.msk [vmem:[#allocation2 + $0x140] sm:$0xff] %vm185_vm0, %v1318_v0  ;;  %229 = vst.msk [vmem:[#allocation2 + $0x150] sm:$0xff] %vm185_vm0, %v1318_v0  ;;  %v263_v14 = vld [vmem:[%s1564_s30 + $0x20] sm:$0xff]  ;;  %v264_v18 = vld [vmem:[%s1564_s30 + $0x28] sm:$0xff] }
  0x22   : > { %228 = vst.msk [vmem:[#allocation2 + $0x148] sm:$0x1] %vm187_vm1, %v1318_v0  ;;  %230 = vst.msk [vmem:[#allocation2 + $0x158] sm:$0x1] %vm187_vm1, %v1318_v0  ;;  %v277_v19 = vld [vmem:[%s1564_s30 + $0x90] sm:$0xff]  ;;  %v284_v21 = vld [vmem:[%s1564_s30 + $0xc8] sm:$0xff] }
  0x23   : > { %231 = vst.msk [vmem:[#allocation2 + $0x160] sm:$0xff] %vm185_vm0, %v1318_v0  ;;  %233 = vst.msk [vmem:[#allocation2 + $0x170] sm:$0xff] %vm185_vm0, %v1318_v0  ;;  %v281_v20 = vld [vmem:[%s1564_s30 + $0xb0] sm:$0xff]  ;;  %v288_v22 = vld [vmem:[%s1564_s30 + $0xe8] sm:$0xff] }
  0x24   : > { %232 = vst.msk [vmem:[#allocation2 + $0x168] sm:$0x1] %vm187_vm1, %v1318_v0  ;;  %234 = vst.msk [vmem:[#allocation2 + $0x178] sm:$0x1] %vm187_vm1, %v1318_v0  ;;  %v285_v23 = vld [vmem:[%s1564_s30 + $0xd0] sm:$0xff]  ;;  %v270_v39 = vld [vmem:[%s1564_s30 + $0x58] sm:$0xff] }
  0x25   : > { %235 = vst.msk [vmem:[#allocation2 + $0x180] sm:$0xff] %vm185_vm0, %v1318_v0  ;;  %237 = vst.msk [vmem:[#allocation2 + $0x190] sm:$0xff] %vm185_vm0, %v1318_v0  ;;  %v289_v24 = vld [vmem:[%s1564_s30 + $0xf0] sm:$0xff]  ;;  %v274_v40 = vld [vmem:[%s1564_s30 + $0x78] sm:$0xff] }
  0x26   : > { %236 = vst.msk [vmem:[#allocation2 + $0x188] sm:$0x1] %vm187_vm1, %v1318_v0  ;;  %238 = vst.msk [vmem:[#allocation2 + $0x198] sm:$0x1] %vm187_vm1, %v1318_v0  ;;  %v269_v34 = vld [vmem:[%s1564_s30 + $0x50] sm:$0xff]  ;;  %v262_v43 = vld [vmem:[%s1564_s30 + $0x18] sm:$0xff] }
  0x27   : > { %239 = vst.msk [vmem:[#allocation2 + $0x1a0] sm:$0xff] %vm185_vm0, %v1318_v0  ;;  %241 = vst.msk [vmem:[#allocation2 + $0x1b0] sm:$0xff] %vm185_vm0, %v1318_v0  ;;  %v273_v35 = vld [vmem:[%s1564_s30 + $0x70] sm:$0xff]  ;;  %v266_v44 = vld [vmem:[%s1564_s30 + $0x38] sm:$0xff] }
  0x28   : > { %240 = vst.msk [vmem:[#allocation2 + $0x1a8] sm:$0x1] %vm187_vm1, %v1318_v0  ;;  %242 = vst.msk [vmem:[#allocation2 + $0x1b8] sm:$0x1] %vm187_vm1, %v1318_v0  ;;  %v261_v41 = vld [vmem:[%s1564_s30 + $0x10] sm:$0xff]  ;;  %v290_v48 = vld [vmem:[%s1564_s30 + $0xf8] sm:$0xff] }
  0x29   : > { %243 = vst.msk [vmem:[#allocation2 + $0x1c0] sm:$0xff] %vm185_vm0, %v1318_v0  ;;  %245 = vst.msk [vmem:[#allocation2 + $0x1d0] sm:$0xff] %vm185_vm0, %v1318_v0  ;;  %v265_v42 = vld [vmem:[%s1564_s30 + $0x30] sm:$0xff]  ;;  %v282_v51 = vld [vmem:[%s1564_s30 + $0xb8] sm:$0xff]  ;;  %s175_s30 = sand.u32 1, %s1300_s13  }
  0x2a   : > { %244 = vst.msk [vmem:[#allocation2 + $0x1c8] sm:$0x1] %vm187_vm1, %v1318_v0  ;;  %246 = vst.msk [vmem:[#allocation2 + $0x1d8] sm:$0x1] %vm187_vm1, %v1318_v0 }
  0x2b   : > { %247 = vst.msk [vmem:[#allocation2 + $0x1e0] sm:$0xff] %vm185_vm0, %v1318_v0  ;;  %249 = vst.msk [vmem:[#allocation2 + $0x1f0] sm:$0xff] %vm185_vm0, %v1318_v0 }
  0x2c   : > { %248 = vst.msk [vmem:[#allocation2 + $0x1e8] sm:$0x1] %vm187_vm1, %v1318_v0  ;;  %250 = vst.msk [vmem:[#allocation2 + $0x1f8] sm:$0x1] %vm187_vm1, %v1318_v0 }
  0x2d   : > { %251 = vst.msk [vmem:[#allocation2 + $0x200] sm:$0xff] %vm185_vm0, %v1318_v0  ;;  %253 = vst.msk [vmem:[#allocation2 + $0x210] sm:$0xff] %vm185_vm0, %v1318_v0 }
  0x2e   : > { %252 = vst.msk [vmem:[#allocation2 + $0x208] sm:$0x1] %vm187_vm1, %v1318_v0  ;;  %254 = vst.msk [vmem:[#allocation2 + $0x218] sm:$0x1] %vm187_vm1, %v1318_v0  ;;  %v1040_v50 = vld [vmem:[#allocation2 + $0x1b0] sm:$0xff] }
  0x2f   : > { %255 = vst.msk [vmem:[#allocation2 + $0x220] sm:$0xff] %vm185_vm0, %v1318_v0  ;;  %257 = vst.msk [vmem:[#allocation2 + $0x230] sm:$0xff] %vm185_vm0, %v1318_v0  ;;  %v1056_v8 = vld [vmem:[#allocation2 + $0x1b1] sm:$0xff] }
  0x30   : > { %256 = vst.msk [vmem:[#allocation2 + $0x228] sm:$0x1] %vm187_vm1, %v1318_v0  ;;  %258 = vst.msk [vmem:[#allocation2 + $0x238] sm:$0x1] %vm187_vm1, %v1318_v0  ;;  %419 = vrot.lane.b32.xlu0 %v1056_v8, %s1320_s5 }
  0x31   : > { %325 = vst.msk [vmem:[#allocation3] sm:$0xff] %vm324_vm2, %v1318_v0  ;;  %326 = vst.msk [vmem:[#allocation3 + $0x8] sm:$0xff] %vm324_vm2, %v1318_v0 }
  0x32   : > { %327 = vst.msk [vmem:[#allocation3 + $0x10] sm:$0xff] %vm324_vm2, %v1318_v0  ;;  %328 = vst.msk [vmem:[#allocation3 + $0x18] sm:$0xff] %vm324_vm2, %v1318_v0 }
  0x33   : > { %329 = vst.msk [vmem:[#allocation3 + $0x20] sm:$0xff] %vm324_vm2, %v1318_v0  ;;  %330 = vst.msk [vmem:[#allocation3 + $0x28] sm:$0xff] %vm324_vm2, %v1318_v0 }
  0x34   : > { %331 = vst.msk [vmem:[#allocation3 + $0x30] sm:$0xff] %vm324_vm2, %v1318_v0  ;;  %332 = vst.msk [vmem:[#allocation3 + $0x38] sm:$0xff] %vm324_vm2, %v1318_v0 }
  0x35   : > { %308 = vst.msk [vmem:[#allocation2 + $0x131] sm:$0xff] %vm185_vm0, %v275_v1  ;;  %312 = vst.msk [vmem:[#allocation2 + $0x171] sm:$0xff] %vm185_vm0, %v279_v2 }
  0x36   : > { %311 = vst.msk [vmem:[#allocation2 + $0x161] sm:$0xff] %vm185_vm0, %v278_v3  ;;  %319 = vst.msk [vmem:[#allocation2 + $0x1f1] sm:$0xff] %vm185_vm0, %v286_v4 }
  0x37   : > { %316 = vst.msk [vmem:[#allocation2 + $0x1c1] sm:$0xff] %vm185_vm0, %v283_v5  ;;  %320 = vst.msk [vmem:[#allocation2 + $0x201] sm:$0xff] %vm185_vm0, %v287_v6 }
  0x38   : > { %300 = vst.msk [vmem:[#allocation2 + $0xa1] sm:$0xff] %vm185_vm0, %v267_v9  ;;  %304 = vst.msk [vmem:[#allocation2 + $0xe1] sm:$0xff] %vm185_vm0, %v271_v10 }
  0x39   : > { %301 = vst.msk [vmem:[#allocation2 + $0xb1] sm:$0xff] %vm185_vm0, %v268_v11  ;;  %305 = vst.msk [vmem:[#allocation2 + $0xf1] sm:$0xff] %vm185_vm0, %v272_v12  ;;  %v763_v12 = vld [vmem:[%s1925_s1] sm:$0xff] }
  0x3a   : > { %292 = vst.msk [vmem:[#allocation2 + $0x11] sm:$0xff] %vm185_vm0, %v259_v13  ;;  %296 = vst.msk [vmem:[#allocation2 + $0x51] sm:$0xff] %vm185_vm0, %v263_v14  ;;  %v764_v13 = vld [vmem:[%s1925_s1 + $0x8] sm:$0xff] }
  0x3b   : > { %309 = vst.msk [vmem:[#allocation2 + $0x141] sm:$0xff] %vm185_vm0, %v276_v15  ;;  %313 = vst.msk [vmem:[#allocation2 + $0x181] sm:$0xff] %vm185_vm0, %v280_v16  ;;  %v1160_v14 = vpack.c.bf16 %v764_v13, %v763_v12  ;;  %v765_v16 = vld [vmem:[%s1925_s1 + $0x10] sm:$0xff] }
  0x3c   : > { %293 = vst.msk [vmem:[#allocation2 + $0x21] sm:$0xff] %vm185_vm0, %v260_v17  ;;  %297 = vst.msk [vmem:[#allocation2 + $0x61] sm:$0xff] %vm185_vm0, %v264_v18  ;;  %v1609_v25 = vld [vmem:[#allocation2 + $0x131] sm:$0xff] }
  0x3d   : > { %310 = vst.msk [vmem:[#allocation2 + $0x151] sm:$0xff] %vm185_vm0, %v277_v19  ;;  %314 = vst.msk [vmem:[#allocation2 + $0x191] sm:$0xff] %vm185_vm0, %v281_v20  ;;  %v1611_v26 = vld [vmem:[#allocation2 + $0x161] sm:$0xff]  ;;  %372 = vrot.lane.b32.xlu1 %v1609_v25, %s1319_s4  ;;  %v1618_v27 = vld [vmem:[#allocation2 + $0x171] sm:$0xff]  ;;  %1161 = vmatprep.subr.bf16.mxu0 %v1160_v14 }
  0x3e   : > { %317 = vst.msk [vmem:[#allocation2 + $0x1d1] sm:$0xff] %vm185_vm0, %v284_v21  ;;  %321 = vst.msk [vmem:[#allocation2 + $0x211] sm:$0xff] %vm185_vm0, %v288_v22  ;;  %v1620_v28 = vld [vmem:[#allocation2 + $0x1c0] sm:$0xff]  ;;  %378 = vrot.lane.b32.xlu0 %v1611_v26, %s1319_s4  ;;  %v1630_v30 = vld [vmem:[#allocation2 + $0x1f1] sm:$0xff]  ;;  %1168 = vmatprep.subr.bf16.mxu1 %v1160_v14 }
  0x3f   : > { %318 = vst.msk [vmem:[#allocation2 + $0x1e1] sm:$0xff] %vm185_vm0, %v285_v23  ;;  %322 = vst.msk [vmem:[#allocation2 + $0x221] sm:$0xff] %vm185_vm0, %v289_v24  ;;  %v1626_v29 = vld [vmem:[#allocation2 + $0x1c1] sm:$0xff]  ;;  %v1673_v47 = vld [vmem:[#allocation2 + $0x1f0] sm:$0xff]  ;;  %1163 = vmatpush3.bf16.msra.mxu0 %v1160_v14  ;;  %1170 = vmatpush3.bf16.msra.mxu1 %v1160_v14 }
  0x40   : > { %345 = vst.msk [vmem:[#allocation3 + $0x8] sm:$0xff] %vm185_vm0, %v1620_v28  ;;  %v1064_v31 = vld [vmem:[#allocation2 + $0xa0] sm:$0xff]  ;;  %v1065_v36 = vld [vmem:[#allocation2 + $0xb0] sm:$0xff]  ;;  %302 = vst.msk [vmem:[#allocation2 + $0xc1] sm:$0xff] %vm185_vm0, %v269_v34 }
  0x41   : > { %380 = vrot.lane.b32.xlu1 %v1618_v27, %s1319_s4  ;;  %v1634_v32 = vld [vmem:[#allocation2 + $0x200] sm:$0xff]  ;;  %306 = vst.msk [vmem:[#allocation2 + $0x101] sm:$0xff] %vm185_vm0, %v273_v35  ;;  %303 = vst.msk [vmem:[#allocation2 + $0xd1] sm:$0xff] %vm185_vm0, %v270_v39  ;;  %v1072_v52 = vld [vmem:[#allocation2 + $0x11] sm:$0xff] }
  0x42   : > { %421 = vrot.lane.b32.xlu0 %v1626_v29, %s1320_s5  ;;  %v1638_v33 = vld [vmem:[#allocation2 + $0x201] sm:$0xff]  ;;  %349 = vst.msk [vmem:[#allocation3 + $0x28] sm:$0xff] %vm185_vm0, %v1634_v32  ;;  %307 = vst.msk [vmem:[#allocation2 + $0x111] sm:$0xff] %vm185_vm0, %v274_v40  ;;  %v1069_v53 = vld [vmem:[#allocation2 + $0xf0] sm:$0xff] }
  0x43   : > { %294 = vst.msk [vmem:[#allocation2 + $0x31] sm:$0xff] %vm185_vm0, %v261_v41  ;;  %298 = vst.msk [vmem:[#allocation2 + $0x71] sm:$0xff] %vm185_vm0, %v265_v42  ;;  %v1068_v49 = vld [vmem:[#allocation2 + $0xe0] sm:$0xff]  ;;  %v1076_v55 = vld [vmem:[#allocation2 + $0x51] sm:$0xff] }
  0x44   : > { %295 = vst.msk [vmem:[#allocation2 + $0x41] sm:$0xff] %vm185_vm0, %v262_v43  ;;  %299 = vst.msk [vmem:[#allocation2 + $0x81] sm:$0xff] %vm185_vm0, %v266_v44  ;;  %v1050_v54 = vld [vmem:[#allocation2 + $0x141] sm:$0xff]  ;;  %v1695_v60 = vld [vmem:[#allocation2 + $0x151] sm:$0xff] }
  0x45   : > { %427 = vrot.lane.b32.xlu1 %v1630_v30, %s1320_s5  ;;  %v1646_v37 = vld [vmem:[#allocation2 + $0x1d0] sm:$0xff]  ;;  %323 = vst.msk [vmem:[#allocation2 + $0x231] sm:$0xff] %vm185_vm0, %v290_v48  ;;  %348 = vst.msk [vmem:[#allocation3 + $0x20] sm:$0xff] %vm185_vm0, %v1673_v47  ;;  %v1073_v56 = vld [vmem:[#allocation2 + $0x21] sm:$0xff] }
  0x46   : > { %v1648_v38 = vld [vmem:[#allocation2 + $0x210] sm:$0xff]  ;;  %472 = vrot.lane.b32.xlu0 %v1064_v31, %s1321_s6  ;;  %346 = vst.msk [vmem:[#allocation3 + $0x10] sm:$0xff] %vm185_vm0, %v1646_v37  ;;  %v1665_v45 = vld [vmem:[#allocation2 + $0x1e0] sm:$0xff]  ;;  %344 = vst.msk [vmem:[#allocation3] sm:$0xff] %vm185_vm0, %v1040_v50 }
  0x47   : > { %350 = vst.msk [vmem:[#allocation3 + $0x30] sm:$0xff] %vm185_vm0, %v1648_v38  ;;  %v1671_v46 = vld [vmem:[#allocation2 + $0x220] sm:$0xff]  ;;  %347 = vst.msk [vmem:[#allocation3 + $0x18] sm:$0xff] %vm185_vm0, %v1665_v45  ;;  %v1058_v62 = vld [vmem:[#allocation2 + $0x1d1] sm:$0xff] }
  0x48   : > { %351 = vst.msk [vmem:[#allocation3 + $0x38] sm:$0xff] %vm185_vm0, %v1671_v46  ;;  %315 = vst.msk [vmem:[#allocation2 + $0x1a1] sm:$0xff] %vm185_vm0, %v282_v51  ;;  %v1054_v57 = vld [vmem:[#allocation2 + $0x181] sm:$0xff]  ;;  %v1701_v63 = vld [vmem:[#allocation2 + $0x191] sm:$0xff] }
  0x49   : > { %429 = vrot.lane.b32.xlu1 %v1638_v33, %s1320_s5  ;;  %v1080_v58 = vld [vmem:[#allocation2 + $0xa1] sm:$0xff]  ;;  %v1081_v0 = vld [vmem:[#allocation2 + $0xb1] sm:$0xff] }
  0x4a   : > { %474 = vrot.lane.b32.xlu0 %v1065_v36, %s1321_s6  ;;  %v1077_v59 = vld [vmem:[#allocation2 + $0x61] sm:$0xff]  ;;  %v1062_v1 = vld [vmem:[#allocation2 + $0x211] sm:$0xff] }
  0x4b   : > { %v1084_v61 = vld [vmem:[#allocation2 + $0xe1] sm:$0xff]  ;;  %v1085_v2 = vld [vmem:[#allocation2 + $0xf1] sm:$0xff] }
  0x4c   : > { %v1710_v3 = vld [vmem:[#allocation2 + $0x1e1] sm:$0xff]  ;;  %v1067_v7 = vld [vmem:[#allocation2 + $0xd0] sm:$0xff]  ;;  %v766_v17 = vld [vmem:[%s1925_s1 + $0x18] sm:$0xff] }
  0x4d   : > { %480 = vrot.lane.b32.xlu1 %v1068_v49, %s1321_s6  ;;  %v1066_v4 = vld [vmem:[#allocation2 + $0xc0] sm:$0xff]  ;;  %v1074_v8 = vld [vmem:[#allocation2 + $0x31] sm:$0xff]  ;;  %v1164_v18 = vpack.c.bf16 %v766_v17, %v765_v16 }
  0x4e   : > { %522 = vrot.lane.b32.xlu0 %v1072_v52, %s1322_s7  ;;  %v1717_v5 = vld [vmem:[#allocation2 + $0x221] sm:$0xff]  ;;  %v1071_v9 = vld [vmem:[#allocation2 + $0x110] sm:$0xff] }
  0x4f   : > { %v1070_v6 = vld [vmem:[#allocation2 + $0x100] sm:$0xff]  ;;  %v1078_v10 = vld [vmem:[#allocation2 + $0x71] sm:$0xff]  ;;  %1165 = vmatprep.subr.bf16.mxu0 %v1164_v18  ;;  %1169 = vmatprep.subr.bf16.mxu1 %v1164_v18 }
  0x50   : > { %v1075_v11 = vld [vmem:[#allocation2 + $0x41] sm:$0xff]  ;;  %1167 = vmatpush3.bf16.msra.mxu0 %v1164_v18  ;;  %1171 = vmatpush3.bf16.msra.mxu1 %v1164_v18  ;;  %v1083_v21 = vld [vmem:[#allocation2 + $0xd1] sm:$0xff] }
  0x51   : > { %482 = vrot.lane.b32.xlu1 %v1069_v53, %s1321_s6  ;;  %v1082_v15 = vld [vmem:[#allocation2 + $0xc1] sm:$0xff]  ;;  %v1087_v22 = vld [vmem:[#allocation2 + $0x111] sm:$0xff] }
  0x52   : > { %374 = vrot.lane.b32.xlu0 %v1050_v54, %s1319_s4  ;;  %v1079_v19 = vld [vmem:[#allocation2 + $0x81] sm:$0xff]  ;;  %v1095_v23 = vld [vmem:[#allocation2 + $0x230] sm:$0xff] }
  0x53   : > { %v1086_v20 = vld [vmem:[#allocation2 + $0x101] sm:$0xff] }
  0x55   : > { %530 = vrot.lane.b32.xlu1 %v1076_v55, %s1322_s7 }
  0x56   : > { %524 = vrot.lane.b32.xlu0 %v1073_v56, %s1322_s7 }
  0x59   : > { %382 = vrot.lane.b32.xlu1 %v1054_v57, %s1319_s4 }
  0x5a   : > { %571 = vrot.lane.b32.xlu0 %v1080_v58, %s1323_s8 }
  0x5d   : > { %532 = vrot.lane.b32.xlu1 %v1077_v59, %s1322_s7 }
  0x5e   : > { %376 = vrot.lane.b32.xlu0 %v1695_v60, %s1319_s4 }
  0x61   : > { %579 = vrot.lane.b32.xlu1 %v1084_v61, %s1323_s8 }
  0x62   : > { %423 = vrot.lane.b32.xlu0 %v1058_v62, %s1320_s5 }
  0x65   : > { %384 = vrot.lane.b32.xlu1 %v1701_v63, %s1319_s4 }
  0x66   : > { %573 = vrot.lane.b32.xlu0 %v1081_v0, %s1323_s8 }
  0x69   : > { %431 = vrot.lane.b32.xlu1 %v1062_v1, %s1320_s5 }
  0x6a   : > { %622 = vrot.lane.b32.xlu0 %v1620_v28, %s1324_s9 }
  0x6d   : > { %581 = vrot.lane.b32.xlu1 %v1085_v2, %s1323_s8 }
  0x6e   : > { %425 = vrot.lane.b32.xlu0 %v1710_v3, %s1320_s5 }
  0x71   : > { %630 = vrot.lane.b32.xlu1 %v1634_v32, %s1324_s9  ;;  %v1111_v32 = vld [vmem:[#allocation2 + $0x231] sm:$0xff] }
  0x72   : > { %476 = vrot.lane.b32.xlu0 %v1066_v4, %s1321_s6 }
  0x75   : > { %433 = vrot.lane.b32.xlu1 %v1717_v5, %s1320_s5 }
  0x76   : > { %624 = vrot.lane.b32.xlu0 %v1646_v37, %s1324_s9 }
  0x79   : > { %484 = vrot.lane.b32.xlu1 %v1070_v6, %s1321_s6 }
  0x7a   : > { %673 = vrot.lane.b32.xlu0 %v1609_v25, %s1325_s10 }
  0x7d   : > { %632 = vrot.lane.b32.xlu1 %v1648_v38, %s1324_s9 }
  0x7e   : > { %478 = vrot.lane.b32.xlu0 %v1067_v7, %s1321_s6 }
  0x81   : > { %681 = vrot.lane.b32.xlu1 %v1618_v27, %s1325_s10  ;;  %v1103_v27 = vld [vmem:[#allocation2 + $0x1a1] sm:$0xff] }
  0x82   : > { %526 = vrot.lane.b32.xlu0 %v1074_v8, %s1322_s7 }
  0x85   : > { %486 = vrot.lane.b32.xlu1 %v1071_v9, %s1321_s6  ;;  %s1037_s6 = sshll.u32 %s175_s30, 6 }
  0x86   : > { %675 = vrot.lane.b32.xlu0 %v1050_v54, %s1325_s10 }
  0x89   : > { %534 = vrot.lane.b32.xlu1 %v1078_v10, %s1322_s7 }
  0x8a   : > { %722 = vrot.lane.b32.xlu0 %v1626_v29, %s1326_s11  ;;  %v371_v24 = vpop.permute.xlu0 %370 }
  0x8b   : > { %395 = vst.msk [vmem:[#allocation3] sm:$0xff] %vm394_vm3, %v371_v24 }
  0x8d   : > { %683 = vrot.lane.b32.xlu1 %v1054_v57, %s1325_s10 }
  0x8e   : > { %528 = vrot.lane.b32.xlu0 %v1075_v11, %s1322_s7 }
  0x91   : > { %730 = vrot.lane.b32.xlu1 %v1638_v33, %s1326_s11 }
  0x92   : > { %575 = vrot.lane.b32.xlu0 %v1082_v15, %s1323_s8 }
  0x95   : > { %536 = vrot.lane.b32.xlu1 %v1079_v19, %s1322_s7  ;;  %s177_s7 = scalar_lea.vmem [#allocation4], %s1037_s6 }
  0x96   : > { %724 = vrot.lane.b32.xlu0 %v1058_v62, %s1326_s11 }
  0x99   : > { %583 = vrot.lane.b32.xlu1 %v1086_v20, %s1323_s8 }
  0x9a   : > { %577 = vrot.lane.b32.xlu0 %v1083_v21, %s1323_s8 }
  0x9d   : > { %732 = vrot.lane.b32.xlu1 %v1062_v1, %s1326_s11 }
  0x9e   : > { %626 = vrot.lane.b32.xlu0 %v1665_v45, %s1324_s9 }
  0xa1   : > { %585 = vrot.lane.b32.xlu1 %v1087_v22, %s1323_s8  ;;  %s1127_s8 = sshll.u32 %s1308_s15, 10  ;;  %s1878_s15 = scalar_lea.sflag [#allocation5], %s175_s30 }
  0xa2   : > { %628 = vrot.lane.b32.xlu0 %v1673_v47, %s1324_s9  ;;  %v420_v25 = vpop.permute.xlu0 %419  ;;  %s1870_s18 = scalar_lea.hbm %s1927_s3, %s1127_s8 }
  0xa3   : > { %444 = vst.msk [vmem:[#allocation3] sm:$0xff] %vm443_vm4, %v420_v25 }
  0xa5   : > { %634 = vrot.lane.b32.xlu1 %v1671_v46, %s1324_s9 }
  0xa6   : > { %677 = vrot.lane.b32.xlu0 %v1695_v60, %s1325_s10 }
  0xa9   : > { %636 = vrot.lane.b32.xlu1 %v1095_v23, %s1324_s9  ;;  %s937_s9 = sshll.u32 %s177_s7, 4  ;;  %s1872_s9 = int_to_ptr.vmem [resolvable:$true] %s937_s9 }
  0xaa   : > { %679 = vrot.lane.b32.xlu0 %v1611_v26, %s1325_s10  ;;  %s1238_s19 = scalar_lea.vmem %s1872_s9, 1024  ;;  %p1245_p1 = scmp.lt.s32.totalorder %s1872_s9, %s1243_s23 }
  0xab   : > { %p1239_p12 = scmp.ne.s32.totalorder %s1872_s9, %s1238_s19  ;;  %p1246_p2 = scmp.lt.s32.totalorder %s1244_s26, %s1238_s19 }
  0xad   : > { %685 = vrot.lane.b32.xlu1 %v1701_v63, %s1325_s10  ;;  %p1240_p13 = pnand %p1239_p12, %p1390_p4  ;;  %p1247_p3 = por %p1246_p2, %p1245_p1 }
  0xae   : > { %726 = vrot.lane.b32.xlu0 %v1710_v3, %s1326_s11 }
  0xaf   : > { %v373_v28 = vpop.permute.xlu1 %372  ;;  %p1241_p0 = pneg %p1240_p13 }
  0xb0   : > { %396 = vst.msk [vmem:[#allocation3 + $0x8] sm:$0xff] %vm394_vm3, %v373_v28  ;;  %v379_v29 = vpop.permute.xlu0 %378 }
  0xb1   : > { %687 = vrot.lane.b32.xlu1 %v1103_v27, %s1325_s10  ;;  %399 = vst.msk [vmem:[#allocation3 + $0x20] sm:$0xff] %vm394_vm3, %v379_v29  ;;  %p1248_p5 = pnand %p1247_p3, %p1241_p0 }
  0xb2   : > { %728 = vrot.lane.b32.xlu0 %v1630_v30, %s1326_s11 }
  0xb3   : > { %v381_v26 = vpop.permute.xlu1 %380 }
  0xb4   : > { %400 = vst.msk [vmem:[#allocation3 + $0x28] sm:$0xff] %vm394_vm3, %v381_v26  ;;  %v422_v31 = vpop.permute.xlu0 %421 }
  0xb5   : > { %734 = vrot.lane.b32.xlu1 %v1717_v5, %s1326_s11  ;;  %445 = vst.msk [vmem:[#allocation3 + $0x8] sm:$0xff] %vm443_vm4, %v422_v31 }
  0xb7   : > { %v428_v33 = vpop.permute.xlu1 %427 }
  0xb8   : > { %448 = vst.msk [vmem:[#allocation3 + $0x20] sm:$0xff] %vm443_vm4, %v428_v33  ;;  %v473_v34 = vpop.permute.xlu0 %472 }
  0xb9   : > { %736 = vrot.lane.b32.xlu1 %v1111_v32, %s1326_s11  ;;  %497 = vst.msk [vmem:[#allocation3] sm:$0xff] %vm496_vm5, %v473_v34 }
  0xbb   : > { %v430_v35 = vpop.permute.xlu1 %429 }
  0xbc   : > { %449 = vst.msk [vmem:[#allocation3 + $0x28] sm:$0xff] %vm443_vm4, %v430_v35  ;;  %v475_v30 = vpop.permute.xlu0 %474  ;;  %v1112_v35 = vld [vmem:[%s1926_s2] ss:$0 sm:$0xff] }
  0xbd   : > { %498 = vst.msk [vmem:[#allocation3 + $0x8] sm:$0xff] %vm496_vm5, %v475_v30 }
  0xbf   : > { %v481_v36 = vpop.permute.xlu1 %480 }
  0xc0   : > { %501 = vst.msk [vmem:[#allocation3 + $0x20] sm:$0xff] %vm496_vm5, %v481_v36  ;;  %v523_v37 = vpop.permute.xlu0 %522 }
  0xc1   : > { %547 = vst.msk [vmem:[#allocation3] sm:$0xff] %vm546_vm6, %v523_v37 }
  0xc3   : > { %v483_v38 = vpop.permute.xlu1 %482 }
  0xc4   : > { %502 = vst.msk [vmem:[#allocation3 + $0x28] sm:$0xff] %vm496_vm5, %v483_v38  ;;  %v375_v39 = vpop.permute.xlu0 %374 }
  0xc5   : > { %397 = vst.msk [vmem:[#allocation3 + $0x10] sm:$0xff] %vm394_vm3, %v375_v39 }
  0xc7   : > { %v531_v40 = vpop.permute.xlu1 %530 }
  0xc8   : > { %551 = vst.msk [vmem:[#allocation3 + $0x20] sm:$0xff] %vm546_vm6, %v531_v40  ;;  %v525_v41 = vpop.permute.xlu0 %524 }
  0xc9   : > { %548 = vst.msk [vmem:[#allocation3 + $0x8] sm:$0xff] %vm546_vm6, %v525_v41 }
  0xcb   : > { %v383_v42 = vpop.permute.xlu1 %382 }
  0xcc   : > { %401 = vst.msk [vmem:[#allocation3 + $0x30] sm:$0xff] %vm394_vm3, %v383_v42  ;;  %v572_v43 = vpop.permute.xlu0 %571 }
  0xcd   : > { %596 = vst.msk [vmem:[#allocation3] sm:$0xff] %vm595_vm7, %v572_v43 }
  0xcf   : > { %v533_v44 = vpop.permute.xlu1 %532 }
  0xd0   : > { %552 = vst.msk [vmem:[#allocation3 + $0x28] sm:$0xff] %vm546_vm6, %v533_v44  ;;  %v377_v45 = vpop.permute.xlu0 %376 }
  0xd1   : > { %398 = vst.msk [vmem:[#allocation3 + $0x18] sm:$0xff] %vm394_vm3, %v377_v45 }
  0xd3   : > { %v580_v46 = vpop.permute.xlu1 %579 }
  0xd4   : > { %600 = vst.msk [vmem:[#allocation3 + $0x20] sm:$0xff] %vm595_vm7, %v580_v46  ;;  %v424_v47 = vpop.permute.xlu0 %423 }
  0xd5   : > { %446 = vst.msk [vmem:[#allocation3 + $0x10] sm:$0xff] %vm443_vm4, %v424_v47 }
  0xd7   : > { %v385_v48 = vpop.permute.xlu1 %384 }
  0xd8   : > { %402 = vst.msk [vmem:[#allocation3 + $0x38] sm:$0xff] %vm394_vm3, %v385_v48  ;;  %v574_v49 = vpop.permute.xlu0 %573 }
  0xd9   : > { %597 = vst.msk [vmem:[#allocation3 + $0x8] sm:$0xff] %vm595_vm7, %v574_v49 }
  0xdb   : > { %v432_v50 = vpop.permute.xlu1 %431 }
  0xdc   : > { %450 = vst.msk [vmem:[#allocation3 + $0x30] sm:$0xff] %vm443_vm4, %v432_v50  ;;  %v623_v51 = vpop.permute.xlu0 %622 }
  0xdd   : > { %647 = vst.msk [vmem:[#allocation3] sm:$0xff] %vm646_vm8, %v623_v51 }
  0xdf   : > { %v582_v52 = vpop.permute.xlu1 %581 }
  0xe0   : > { %601 = vst.msk [vmem:[#allocation3 + $0x28] sm:$0xff] %vm595_vm7, %v582_v52  ;;  %v426_v53 = vpop.permute.xlu0 %425 }
  0xe1   : > { %447 = vst.msk [vmem:[#allocation3 + $0x18] sm:$0xff] %vm443_vm4, %v426_v53 }
  0xe3   : > { %v631_v54 = vpop.permute.xlu1 %630 }
  0xe4   : > { %651 = vst.msk [vmem:[#allocation3 + $0x20] sm:$0xff] %vm646_vm8, %v631_v54  ;;  %v477_v55 = vpop.permute.xlu0 %476 }
  0xe5   : > { %499 = vst.msk [vmem:[#allocation3 + $0x10] sm:$0xff] %vm496_vm5, %v477_v55 }
  0xe7   : > { %v434_v56 = vpop.permute.xlu1 %433 }
  0xe8   : > { %451 = vst.msk [vmem:[#allocation3 + $0x38] sm:$0xff] %vm443_vm4, %v434_v56  ;;  %v625_v57 = vpop.permute.xlu0 %624 }
  0xe9   : > { %648 = vst.msk [vmem:[#allocation3 + $0x8] sm:$0xff] %vm646_vm8, %v625_v57 }
  0xeb   : > { %v485_v58 = vpop.permute.xlu1 %484 }
  0xec   : > { %503 = vst.msk [vmem:[#allocation3 + $0x30] sm:$0xff] %vm496_vm5, %v485_v58  ;;  %v674_v59 = vpop.permute.xlu0 %673 }
  0xed   : > { %698 = vst.msk [vmem:[#allocation3] sm:$0xff] %vm697_vm9, %v674_v59 }
  0xef   : > { %v633_v60 = vpop.permute.xlu1 %632 }
  0xf0   : > { %652 = vst.msk [vmem:[#allocation3 + $0x28] sm:$0xff] %vm646_vm8, %v633_v60  ;;  %v479_v61 = vpop.permute.xlu0 %478 }
  0xf1   : > { %500 = vst.msk [vmem:[#allocation3 + $0x18] sm:$0xff] %vm496_vm5, %v479_v61 }
  0xf3   : > { %v682_v62 = vpop.permute.xlu1 %681 }
  0xf4   : > { %702 = vst.msk [vmem:[#allocation3 + $0x20] sm:$0xff] %vm697_vm9, %v682_v62  ;;  %v527_v63 = vpop.permute.xlu0 %526 }
  0xf5   : > { %549 = vst.msk [vmem:[#allocation3 + $0x10] sm:$0xff] %vm546_vm6, %v527_v63 }
  0xf7   : > { %v487_v0 = vpop.permute.xlu1 %486 }
  0xf8   : > { %504 = vst.msk [vmem:[#allocation3 + $0x38] sm:$0xff] %vm496_vm5, %v487_v0  ;;  %v676_v1 = vpop.permute.xlu0 %675 }
  0xf9   : > { %699 = vst.msk [vmem:[#allocation3 + $0x8] sm:$0xff] %vm697_vm9, %v676_v1 }
  0xfb   : > { %v535_v2 = vpop.permute.xlu1 %534 }
  0xfc   : > { %553 = vst.msk [vmem:[#allocation3 + $0x30] sm:$0xff] %vm546_vm6, %v535_v2  ;;  %v723_v3 = vpop.permute.xlu0 %722 }
  0xfd   : > { %747 = vst.msk [vmem:[#allocation3] sm:$0xff] %vm746_vm10, %v723_v3 }
  0xff   : > { %v684_v4 = vpop.permute.xlu1 %683 }
 0x100   : > { %703 = vst.msk [vmem:[#allocation3 + $0x28] sm:$0xff] %vm697_vm9, %v684_v4  ;;  %v529_v5 = vpop.permute.xlu0 %528 }
 0x101   : > { %550 = vst.msk [vmem:[#allocation3 + $0x18] sm:$0xff] %vm546_vm6, %v529_v5 }
 0x103   : > { %v731_v6 = vpop.permute.xlu1 %730 }
 0x104   : > { %751 = vst.msk [vmem:[#allocation3 + $0x20] sm:$0xff] %vm746_vm10, %v731_v6  ;;  %v576_v7 = vpop.permute.xlu0 %575  ;;  %v755_v8 = vld [vmem:[#allocation3] sm:$0xff] }
 0x105   : > { %598 = vst.msk [vmem:[#allocation3 + $0x10] sm:$0xff] %vm595_vm7, %v576_v7  ;;  %1148 = vmatprep.mubr.msk.f32.mxu0 %vm774_vm11, %v755_v8 }
 0x107   : > { %v537_v9 = vpop.permute.xlu1 %536 }
 0x108   : > { %554 = vst.msk [vmem:[#allocation3 + $0x38] sm:$0xff] %vm546_vm6, %v537_v9  ;;  %v725_v10 = vpop.permute.xlu0 %724 }
 0x109   : > { %748 = vst.msk [vmem:[#allocation3 + $0x8] sm:$0xff] %vm746_vm10, %v725_v10 }
 0x10b   : > { %v584_v11 = vpop.permute.xlu1 %583  ;;  %v759_v12 = vld [vmem:[#allocation3 + $0x20] sm:$0xff] }
 0x10c   : > { %602 = vst.msk [vmem:[#allocation3 + $0x30] sm:$0xff] %vm595_vm7, %v584_v11  ;;  %1154 = vmatprep.mubr.msk.f32.mxu1 %vm774_vm11, %v759_v12  ;;  %v578_v13 = vpop.permute.xlu0 %577 }
 0x10d   : > { %599 = vst.msk [vmem:[#allocation3 + $0x18] sm:$0xff] %vm595_vm7, %v578_v13 }
 0x10f   : > { %v733_v14 = vpop.permute.xlu1 %732 }
 0x110   : > { %752 = vst.msk [vmem:[#allocation3 + $0x28] sm:$0xff] %vm746_vm10, %v733_v14  ;;  %v627_v15 = vpop.permute.xlu0 %626  ;;  %v756_v16 = vld [vmem:[#allocation3 + $0x8] sm:$0xff] }
 0x111   : > { %649 = vst.msk [vmem:[#allocation3 + $0x10] sm:$0xff] %vm646_vm8, %v627_v15  ;;  %1149 = vmatmul.mubr.msk.f32.vlgmr.msra.gmra.mrb[0].mxu0 %vm774_vm11, %v756_v16 }
 0x113   : > { %v586_v17 = vpop.permute.xlu1 %585 }
 0x114   : > { %603 = vst.msk [vmem:[#allocation3 + $0x38] sm:$0xff] %vm595_vm7, %v586_v17  ;;  %v629_v18 = vpop.permute.xlu0 %628 }
 0x115   : > { %650 = vst.msk [vmem:[#allocation3 + $0x18] sm:$0xff] %vm646_vm8, %v629_v18 }
 0x117   : > { %v635_v19 = vpop.permute.xlu1 %634  ;;  %v760_v20 = vld [vmem:[#allocation3 + $0x28] sm:$0xff] }
 0x118   : > { %653 = vst.msk [vmem:[#allocation3 + $0x30] sm:$0xff] %vm646_vm8, %v635_v19  ;;  %1155 = vmatmul.mubr.msk.f32.vlgmr.msra.gmra.mrb[0].mxu1 %vm774_vm11, %v760_v20  ;;  %v678_v21 = vpop.permute.xlu0 %677 }
 0x119   : > { %700 = vst.msk [vmem:[#allocation3 + $0x10] sm:$0xff] %vm697_vm9, %v678_v21 }
 0x11b   : > { %v637_v22 = vpop.permute.xlu1 %636 }
 0x11c   : > { %654 = vst.msk [vmem:[#allocation3 + $0x38] sm:$0xff] %vm646_vm8, %v637_v22  ;;  %v680_v23 = vpop.permute.xlu0 %679 }
 0x11d   : > { %701 = vst.msk [vmem:[#allocation3 + $0x18] sm:$0xff] %vm697_vm9, %v680_v23 }
 0x11f   : > { %v686_v24 = vpop.permute.xlu1 %685 }
 0x120   : > { %704 = vst.msk [vmem:[#allocation3 + $0x30] sm:$0xff] %vm697_vm9, %v686_v24  ;;  %v727_v25 = vpop.permute.xlu0 %726 }
 0x121   : > { %749 = vst.msk [vmem:[#allocation3 + $0x10] sm:$0xff] %vm746_vm10, %v727_v25 }
 0x123   : > { %v688_v27 = vpop.permute.xlu1 %687 }
 0x124   : > { %705 = vst.msk [vmem:[#allocation3 + $0x38] sm:$0xff] %vm697_vm9, %v688_v27  ;;  %v729_v28 = vpop.permute.xlu0 %728 }
 0x125   : > { %750 = vst.msk [vmem:[#allocation3 + $0x18] sm:$0xff] %vm746_vm10, %v729_v28 }
 0x127   : > { %v735_v29 = vpop.permute.xlu1 %734 }
 0x128   : > { %753 = vst.msk [vmem:[#allocation3 + $0x30] sm:$0xff] %vm746_vm10, %v735_v29  ;;  %v757_v26 = vld [vmem:[#allocation3 + $0x10] sm:$0xff] }
 0x129   : > { %1151 = vmatprep.mubr.msk.f32.mxu0 %vm774_vm11, %v757_v26 }
 0x12b   : > { %v737_v31 = vpop.permute.xlu1 %736 }
 0x12c   : > { %754 = vst.msk [vmem:[#allocation3 + $0x38] sm:$0xff] %vm746_vm10, %v737_v31  ;;  %v758_v32 = vld [vmem:[#allocation3 + $0x18] sm:$0xff] }
 0x12d   : > { %1152 = vmatmul.mubr.msk.f32.gmra.mrb[2].mxu0 %vm774_vm11, %v758_v32 }
 0x12f   : > { %v761_v33 = vld [vmem:[#allocation3 + $0x30] sm:$0xff] }
 0x130   : > { %1157 = vmatprep.mubr.msk.f32.mxu1 %vm774_vm11, %v761_v33 }
 0x133   : > { %v762_v34 = vld [vmem:[#allocation3 + $0x38] sm:$0xff] }
 0x134   : > { %1158 = vmatmul.mubr.msk.f32.gmra.mrb[2].mxu1 %vm774_vm11, %v762_v34 }
 0x1e4   : > { %v1150_v30 = vpop.f32.mrb[0].mxu0 }
 0x1e5   : > { %v871_v36 = vadd.f32 %v1150_v30, %v1112_v35  ;;  %v865_v37 = vpop.f32.mrb[1].mxu0 }
 0x1e6   : > { %v866_v38 = vadd.f32 %v1112_v35, %v865_v37 }
 0x1e7   : > { %v905_v39 = vmax.f32 %v871_v36, 0.0 }
 0x1e8   : > { %v904_v40 = vmax.f32 %v866_v38, 0.0 }
 0x1e9   : > { %914 = vst.msk [vmem:[%s177_s7 + $0x8] sm:$0xff] %vm912_vm12, %v905_v39 }
 0x1ea   : > { %913 = vst.msk [vmem:[%s177_s7] sm:$0xff] %vm912_vm12, %v904_v40 }
 0x1eb   : > { %v1156_v41 = vpop.f32.mrb[0].mxu1 }
 0x1ec   : > { %v891_v42 = vadd.f32 %v1156_v41, %v1112_v35  ;;  %v885_v43 = vpop.f32.mrb[1].mxu1 }
 0x1ed   : > { %v886_v44 = vadd.f32 %v1112_v35, %v885_v43 }
 0x1ee   : > { %v909_v45 = vmax.f32 %v891_v42, 0.0 }
 0x1ef   : > { %v908_v46 = vmax.f32 %v886_v44, 0.0 }
 0x1f0   : > { %918 = vst.msk [vmem:[%s177_s7 + $0x28] sm:$0xff] %vm912_vm12, %v909_v45 }
 0x1f1   : > { %917 = vst.msk [vmem:[%s177_s7 + $0x20] sm:$0xff] %vm912_vm12, %v908_v46 }
 0x200   : > { %v1153_v47 = vpop.f32.mrb[2].mxu0 }
 0x201   : > { %v881_v48 = vadd.f32 %v1153_v47, %v1112_v35  ;;  %v875_v49 = vpop.f32.mrb[3].mxu0 }
 0x202   : > { %v876_v50 = vadd.f32 %v1112_v35, %v875_v49 }
 0x203   : > { %v907_v51 = vmax.f32 %v881_v48, 0.0 }
 0x204   : > { %v906_v52 = vmax.f32 %v876_v50, 0.0 }
 0x205   : > { %916 = vst.msk [vmem:[%s177_s7 + $0x18] sm:$0xff] %vm912_vm12, %v907_v51 }
 0x206   : > { %915 = vst.msk [vmem:[%s177_s7 + $0x10] sm:$0xff] %vm912_vm12, %v906_v52 }
 0x207   : > { %v1159_v53 = vpop.f32.mrb[2].mxu1 }
 0x208   : > { %v901_v54 = vadd.f32 %v1159_v53, %v1112_v35  ;;  %v895_v55 = vpop.f32.mrb[3].mxu1 }
 0x209   : > { %v896_v56 = vadd.f32 %v1112_v35, %v895_v55 }
 0x20a   : > { %v911_v57 = vmax.f32 %v901_v54, 0.0 }
 0x20b   : > { %v910_v58 = vmax.f32 %v896_v56, 0.0 }
 0x20c   : > { %920 = vst.msk [vmem:[%s177_s7 + $0x38] sm:$0xff] %vm912_vm12, %v911_v57 }
 0x20d   : > { %919 = vst.msk [vmem:[%s177_s7 + $0x30] sm:$0xff] %vm912_vm12, %v910_v58 }
 0x20e   : > { %1251 = shalt.err (!%p1248_p5)
}
 0x20f   : > { %s1252_s27 = scalar_lea.hbm %s1870_s18, 1024  ;;  %s1256_s30 = scalar_lea.hbm %s1927_s3, 2048 }
 0x210   : > { %p1253_p6 = scmp.ne.s32.totalorder %s1870_s18, %s1252_s27  ;;  %p1257_p10 = scmp.lt.u32.totalorder %s1870_s18, %s1927_s3 }
 0x211   : > { %p1258_p11 = scmp.lt.u32.totalorder %s1256_s30, %s1252_s27  ;;  %p1260_p13 = scmp.lt.u32.totalorder %s1252_s27, %s1870_s18 }
 0x212   : > { %p1254_p7 = pnand %p1253_p6, %p1390_p4 }
 0x213   : > { %p1259_p12 = por %p1258_p11, %p1257_p10 }
 0x214   : > { %p1255_p9 = pneg %p1254_p7 }
 0x215   : > { %p1261_p0 = por %p1260_p13, %p1259_p12 }
 0x217   : > { %p1262_p1 = pnand %p1261_p0, %p1255_p9 }
 0x219   : > { %1265 = shalt.err (!%p1262_p1)
}
 0x21a   : > { %s1328_s6 = smov 128   ;;  %s1329_s7 = smov 8  }
 0x21b   : > { %1172 = dma.vmem_to_hbm [thread:$0]  (%p1390_p4), %s1872_s9, 1024, %s1870_s18, %s1878_s15, %s1328_s6, %s1328_s6, %s1329_s7  }
 0x21c PF: > { %p1178_p2 = scmp.ge.s32.totalorder %s1316_s17, 2  ;;  %s952_s8 = sand.u32 1, %s1296_s12  }
 0x21d   : > { %s953_s10 = scalar_lea.sflag [#allocation5], %s952_s8 }
 0x21e   : > { %p1175_p3 = pnand %p1178_p2, %p1397_p8 }
 0x220   : > { %1291 = dma.done.wait (!%p1175_p3), %s953_s10, 1024  }
 0x221   : > { %1293 = vsyncadd (!%p1175_p3), %s953_s10, 4294966272  ;;  %s16_s17 = sadd.s32 1, %s1316_s17   ;;  %s1930_s12 = smov %s1300_s13 }
 0x222   : > { %p13_p5 = scmp.ge.s32.totalorder %s16_s17, 4   ;;  %s1931_s13 = smov %s1304_s14 }
 0x223   : > { %s1932_s14 = smov %s1403_s25  ;;  %s1933_s15 = smov %s1312_s16 }
 0x224   : > { %s1934_s16 = smov %s1936_s20  ;;  %15 = sbr.rel (!%p13_p5) target bundleno = 4 (0x4), region = 74 }
 0x22b   :  { %958 = vsyncpa [#allocation5], 1 }
 0x22c   :  { %960 = vsyncpa [#allocation5 + $0x1], 1 }

</bundles_post_ra>
